<compile_context>
chip_gen: v7x
topology: tpu7x:2x2x1
jax: 0.10.0
libtpu: 0.0.40
codegen_flags: <defaults>
</compile_context>

<pallas_src>
import functools

import jax
import jax.numpy as jnp
import numpy as np
from jax.experimental import pallas as pl
from jax.experimental.pallas import tpu as pltpu


def _round_up(x, m):
    return ((x + m - 1) // m) * m


def _positionwise_ff_kernel(x_ref, g_ref, beta_ref, w1_ref, b1_ref,
                            w2_ref, b2_ref, o_ref, xn_ref, acc_ref, *, eps):
    # grid = (row_tiles, d_inner_tiles); d_inner (reduction) is the last axis.
    k = pl.program_id(1)

    @pl.when(k == 0)
    def _init():
        # LayerNorm (f32 statistics), computed once per row tile, cached in VMEM.
        x = x_ref[...].astype(jnp.float32)                      # (tm, d_model)
        mean = jnp.mean(x, axis=-1, keepdims=True)
        centered = x - mean
        var = jnp.mean(centered * centered, axis=-1, keepdims=True)
        xn = centered * jax.lax.rsqrt(var + eps)
        xn = xn * g_ref[...] + beta_ref[...]                    # affine gamma/beta
        xn_ref[...] = xn.astype(xn_ref.dtype)                   # bf16 into MXU
        acc_ref[...] = jnp.zeros_like(acc_ref)

    # CoreNet chunk: Linear(d_model -> tk) + ReLU  (bf16 operands, f32 acc)
    h = jnp.dot(xn_ref[...], w1_ref[...],
                preferred_element_type=jnp.float32) + b1_ref[...]
    h = jnp.maximum(h, 0.0)
    # TODO(synk): dropout is identity at inference time (no RNG applied here).

    # Partial Linear(tk -> d_model), accumulated over d_inner tiles.
    acc_ref[...] += jnp.dot(h.astype(w2_ref.dtype), w2_ref[...],
                            preferred_element_type=jnp.float32)

    @pl.when(k == pl.num_programs(1) - 1)
    def _finalize():
        y = acc_ref[...] + b2_ref[...]
        x = x_ref[...].astype(jnp.float32)
        # IdentityResidualGate: inp + relu(core_out)
        o_ref[...] = (x + jnp.maximum(y, 0.0)).astype(o_ref.dtype)


def positionwise_ff(inp, gamma, beta, w1, b1, w2, b2, *, eps=1e-5,
                    tile_rows=256, tile_inner=512,
                    compute_dtype=jnp.bfloat16):
    """inp: [seq, batch, d_model].  Returns same shape/dtype."""
    seq, bsz, d_model = inp.shape
    d_inner = w1.shape[1]
    n = seq * bsz
    x2d = inp.reshape(n, d_model)

    # Row tile: big for the MXU, clamped for tiny inputs; Pallas masks the tail.
    tm = min(tile_rows, _round_up(n, 8))
    grid_rows = pl.cdiv(n, tm)

    # d_inner tile must divide exactly (a padded K tile would corrupt the acc).
    tk = min(tile_inner, d_inner)
    if d_inner % tk != 0:
        tk = d_inner
    grid_k = d_inner // tk

    # Weights in the MXU compute dtype (halves weight VMEM for bf16);
    # LayerNorm params and biases stay f32.
    w1c = w1.astype(compute_dtype)
    w2c = w2.astype(compute_dtype)
    gamma = gamma.astype(jnp.float32)
    beta = beta.astype(jnp.float32)
    b1 = b1.astype(jnp.float32)
    b2 = b2.astype(jnp.float32)

    # Size the scoped VMEM limit from actual (double-buffered) buffer usage.
    cb = np.dtype(compute_dtype).itemsize
    xb = np.dtype(inp.dtype).itemsize
    est = 2 * (tm * d_model * xb          # x tile
               + 2 * d_model * 4          # gamma, beta
               + d_model * tk * cb        # W1 tile
               + tk * 4                   # b1 tile
               + tk * d_model * cb        # W2 tile
               + d_model * 4              # b2
               + tm * d_model * xb)       # out tile
    est += tm * d_model * (cb + 4)        # xn + acc scratch
    vmem_limit = int(min(max(2 * est, 32 * 1024 * 1024), 60 * 1024 * 1024))

    kernel = functools.partial(_positionwise_ff_kernel, eps=eps)

    out2d = pl.pallas_call(
        kernel,
        out_shape=jax.ShapeDtypeStruct((n, d_model), inp.dtype),
        grid_spec=pltpu.PrefetchScalarGridSpec(
            num_scalar_prefetch=0,
            grid=(grid_rows, grid_k),
            in_specs=[
                pl.BlockSpec((tm, d_model), lambda i, k: (i, 0)),    # x rows
                pl.BlockSpec((1, d_model), lambda i, k: (0, 0)),     # gamma
                pl.BlockSpec((1, d_model), lambda i, k: (0, 0)),     # beta
                pl.BlockSpec((d_model, tk), lambda i, k: (0, k)),    # W1 tile
                pl.BlockSpec((1, tk), lambda i, k: (0, k)),          # b1 tile
                pl.BlockSpec((tk, d_model), lambda i, k: (k, 0)),    # W2 tile
                pl.BlockSpec((1, d_model), lambda i, k: (0, 0)),     # b2
            ],
            out_specs=pl.BlockSpec((tm, d_model), lambda i, k: (i, 0)),
            scratch_shapes=[
                pltpu.VMEM((tm, d_model), compute_dtype),   # cached LayerNorm(x)
                pltpu.VMEM((tm, d_model), jnp.float32),     # f32 accumulator for y
            ],
        ),
        compiler_params=pltpu.CompilerParams(
            dimension_semantics=("parallel", "arbitrary"),
            vmem_limit_bytes=vmem_limit),
    )(x2d, gamma, beta, w1c, b1, w2c, b2)

    return out2d.reshape(seq, bsz, d_model)


def _reference(inp, gamma, beta, w1, b1, w2, b2, eps=1e-5):
    x = inp.astype(jnp.float32)
    mean = jnp.mean(x, axis=-1, keepdims=True)
    var = jnp.mean((x - mean) ** 2, axis=-1, keepdims=True)
    xn = (x - mean) / jnp.sqrt(var + eps) * gamma[0] + beta[0]
    h = jnp.maximum(xn @ w1 + b1[0], 0.0)
    y = h @ w2 + b2[0]
    return (x + jnp.maximum(y, 0.0)).astype(inp.dtype)


if __name__ == "__main__":
    # Small, module-consistent shapes: seq=8, batch=2, d_model=32, d_inner=64.
    seq, bsz, d_model, d_inner = 8, 2, 32, 64
    key = jax.random.PRNGKey(0)
    k_inp, k_w1, k_b1, k_w2, k_b2 = jax.random.split(key, 5)

    inp = jax.random.normal(k_inp, (seq, bsz, d_model), dtype=jnp.float32)

    # Deterministic parameter init (synthetic; not a checkpoint load).
    w1 = jax.random.normal(k_w1, (d_model, d_inner), dtype=jnp.float32) * 0.05
    b1 = jax.random.normal(k_b1, (1, d_inner), dtype=jnp.float32) * 0.01
    w2 = jax.random.normal(k_w2, (d_inner, d_model), dtype=jnp.float32) * 0.05
    b2 = jax.random.normal(k_b2, (1, d_model), dtype=jnp.float32) * 0.01
    gamma = jnp.ones((1, d_model), dtype=jnp.float32)   # LayerNorm weight
    beta = jnp.zeros((1, d_model), dtype=jnp.float32)   # LayerNorm bias

    ref = _reference(inp, gamma, beta, w1, b1, w2, b2)

    # 1) f32-compute path: validates fused math tightly.
    out_f32 = positionwise_ff(inp, gamma, beta, w1, b1, w2, b2,
                              compute_dtype=jnp.float32)
    out_f32 = jax.block_until_ready(out_f32)
    assert out_f32.shape == inp.shape and out_f32.dtype == inp.dtype
    assert jnp.allclose(out_f32, ref, atol=1e-4, rtol=1e-4), "f32 mismatch vs reference"

    # 2) Default bf16-into-MXU path (production config): bf16-level tolerance.
    out_bf16 = positionwise_ff(inp, gamma, beta, w1, b1, w2, b2)
    out_bf16 = jax.block_until_ready(out_bf16)
    assert out_bf16.shape == inp.shape and out_bf16.dtype == inp.dtype
    assert jnp.allclose(out_bf16, ref, atol=3e-2, rtol=3e-2), "bf16 mismatch vs reference"

    print("KERNEL_OK")
</pallas_src>

<mosaic_0001>
module attributes {stable_mosaic.version = 11 : i64} {
  func.func @_positionwise_ff_kernel(%arg0: i32, %arg1: i32, %arg2: memref<16x32xf32, #tpu.memory_space<vmem>>, %arg3: memref<1x32xf32, #tpu.memory_space<vmem>>, %arg4: memref<1x32xf32, #tpu.memory_space<vmem>>, %arg5: memref<32x64xf32, #tpu.memory_space<vmem>>, %arg6: memref<1x64xf32, #tpu.memory_space<vmem>>, %arg7: memref<64x32xf32, #tpu.memory_space<vmem>>, %arg8: memref<1x32xf32, #tpu.memory_space<vmem>>, %arg9: memref<16x32xf32, #tpu.memory_space<vmem>>, %arg10: memref<16x32xf32, #tpu.memory_space<vmem>>, %arg11: memref<16x32xf32, #tpu.memory_space<vmem>>) attributes {dimension_semantics = [#tpu.dimension_semantics<parallel>, #tpu.dimension_semantics<arbitrary>], iteration_bounds = array<i64: 1, 1>, scalar_prefetch = 0 : i64, scratch_operands = 2 : i64, tpu.core_type = #tpu.core_type<tc>, window_params = [{transform_indices = @transform_0, window_bounds = array<i64: 16, 32>}, {pipeline_mode = #tpu.pipeline_mode<synchronous>, transform_indices = @transform_1, window_bounds = array<i64: 1, 32>}, {pipeline_mode = #tpu.pipeline_mode<synchronous>, transform_indices = @transform_2, window_bounds = array<i64: 1, 32>}, {transform_indices = @transform_3, window_bounds = array<i64: 32, 64>}, {transform_indices = @transform_4, window_bounds = array<i64: 1, 64>}, {transform_indices = @transform_5, window_bounds = array<i64: 64, 32>}, {pipeline_mode = #tpu.pipeline_mode<synchronous>, transform_indices = @transform_6, window_bounds = array<i64: 1, 32>}, {transform_indices = @transform_7, window_bounds = array<i64: 16, 32>}]} {
    %c0_i32 = arith.constant 0 : i32
    %0 = arith.cmpi eq, %arg1, %c0_i32 : i32
    %1 = arith.extui %0 : i1 to i32
    %c0_i32_0 = arith.constant 0 : i32
    %2 = arith.cmpi ne, %1, %c0_i32_0 : i32
    scf.if %2 {
      %c0_16 = arith.constant 0 : index
      %c0_17 = arith.constant 0 : index
      %19 = vector.load %arg2[%c0_16, %c0_17] : memref<16x32xf32, #tpu.memory_space<vmem>>, vector<16x32xf32>
      %cst_18 = arith.constant dense<0.000000e+00> : vector<16xf32>
      %20 = vector.multi_reduction <add>, %19, %cst_18 [1] : vector<16x32xf32> to vector<16xf32>
      %21 = vector.shape_cast %20 : vector<16xf32> to vector<16x1xf32>
      %cst_19 = arith.constant 3.200000e+01 : f32
      %22 = vector.broadcast %cst_19 : f32 to vector<16x1xf32>
      %23 = arith.divf %21, %22 : vector<16x1xf32>
      %24 = vector.broadcast %23 : vector<16x1xf32> to vector<16x32xf32>
      %25 = arith.subf %19, %24 : vector<16x32xf32>
      %26 = arith.mulf %25, %25 : vector<16x32xf32>
      %cst_20 = arith.constant dense<0.000000e+00> : vector<16xf32>
      %27 = vector.multi_reduction <add>, %26, %cst_20 [1] : vector<16x32xf32> to vector<16xf32>
      %28 = vector.shape_cast %27 : vector<16xf32> to vector<16x1xf32>
      %cst_21 = arith.constant 3.200000e+01 : f32
      %29 = vector.broadcast %cst_21 : f32 to vector<16x1xf32>
      %30 = arith.divf %28, %29 : vector<16x1xf32>
      %cst_22 = arith.constant 9.99999974E-6 : f32
      %31 = vector.broadcast %cst_22 : f32 to vector<16x1xf32>
      %32 = arith.addf %30, %31 : vector<16x1xf32>
      %33 = math.rsqrt %32 : vector<16x1xf32>
      %34 = vector.broadcast %33 : vector<16x1xf32> to vector<16x32xf32>
      %35 = arith.mulf %25, %34 : vector<16x32xf32>
      %c0_23 = arith.constant 0 : index
      %c0_24 = arith.constant 0 : index
      %36 = vector.load %arg3[%c0_23, %c0_24] : memref<1x32xf32, #tpu.memory_space<vmem>>, vector<1x32xf32>
      %37 = vector.broadcast %36 : vector<1x32xf32> to vector<16x32xf32>
      %38 = arith.mulf %35, %37 : vector<16x32xf32>
      %c0_25 = arith.constant 0 : index
      %c0_26 = arith.constant 0 : index
      %39 = vector.load %arg4[%c0_25, %c0_26] : memref<1x32xf32, #tpu.memory_space<vmem>>, vector<1x32xf32>
      %40 = vector.broadcast %39 : vector<1x32xf32> to vector<16x32xf32>
      %41 = arith.addf %38, %40 : vector<16x32xf32>
      %c0_27 = arith.constant 0 : index
      %c0_28 = arith.constant 0 : index
      %42 = vector.load %arg10[%c0_27, %c0_28] : memref<16x32xf32, #tpu.memory_space<vmem>>, vector<16x32xf32>
      tpu.vector_store %arg10[%c0_27, %c0_28], %41 {strides = array<i32>} : memref<16x32xf32, #tpu.memory_space<vmem>>, vector<16x32xf32>,
      %cst_29 = arith.constant 0.000000e+00 : f32
      %43 = vector.broadcast %cst_29 : f32 to vector<16x32xf32>
      %c0_30 = arith.constant 0 : index
      %c0_31 = arith.constant 0 : index
      %44 = vector.load %arg11[%c0_30, %c0_31] : memref<16x32xf32, #tpu.memory_space<vmem>>, vector<16x32xf32>
      tpu.vector_store %arg11[%c0_30, %c0_31], %43 {strides = array<i32>} : memref<16x32xf32, #tpu.memory_space<vmem>>, vector<16x32xf32>,
    } else {
    }
    %c0 = arith.constant 0 : index
    %c0_1 = arith.constant 0 : index
    %3 = vector.load %arg10[%c0, %c0_1] : memref<16x32xf32, #tpu.memory_space<vmem>>, vector<16x32xf32>
    %c0_2 = arith.constant 0 : index
    %c0_3 = arith.constant 0 : index
    %4 = vector.load %arg5[%c0_2, %c0_3] : memref<32x64xf32, #tpu.memory_space<vmem>>, vector<32x64xf32>
    %cst = arith.constant dense<0.000000e+00> : vector<16x64xf32>
    %5 = tpu.matmul %3, %4, %cst {dimension_numbers = #tpu.dot_dimension_numbers<[1], [0], [0], [1], [0, 0, 1, 1], [], []>} : vector<16x32xf32>, vector<32x64xf32>, vector<16x64xf32> -> vector<16x64xf32>
    %c0_4 = arith.constant 0 : index
    %c0_5 = arith.constant 0 : index
    %6 = vector.load %arg6[%c0_4, %c0_5] : memref<1x64xf32, #tpu.memory_space<vmem>>, vector<1x64xf32>
    %7 = vector.broadcast %6 : vector<1x64xf32> to vector<16x64xf32>
    %8 = arith.addf %5, %7 : vector<16x64xf32>
    %cst_6 = arith.constant 0.000000e+00 : f32
    %9 = vector.broadcast %cst_6 : f32 to vector<16x64xf32>
    %10 = arith.maximumf %8, %9 : vector<16x64xf32>
    %c0_7 = arith.constant 0 : index
    %c0_8 = arith.constant 0 : index
    %11 = vector.load %arg11[%c0_7, %c0_8] : memref<16x32xf32, #tpu.memory_space<vmem>>, vector<16x32xf32>
    %c0_9 = arith.constant 0 : index
    %c0_10 = arith.constant 0 : index
    %12 = vector.load %arg7[%c0_9, %c0_10] : memref<64x32xf32, #tpu.memory_space<vmem>>, vector<64x32xf32>
    %cst_11 = arith.constant dense<0.000000e+00> : vector<16x32xf32>
    %13 = tpu.matmul %10, %12, %cst_11 {dimension_numbers = #tpu.dot_dimension_numbers<[1], [0], [0], [1], [0, 0, 1, 1], [], []>} : vector<16x64xf32>, vector<64x32xf32>, vector<16x32xf32> -> vector<16x32xf32>
    %14 = arith.addf %11, %13 : vector<16x32xf32>
    %c0_12 = arith.constant 0 : index
    %c0_13 = arith.constant 0 : index
    %15 = vector.load %arg11[%c0_12, %c0_13] : memref<16x32xf32, #tpu.memory_space<vmem>>, vector<16x32xf32>
    tpu.vector_store %arg11[%c0_12, %c0_13], %14 {strides = array<i32>} : memref<16x32xf32, #tpu.memory_space<vmem>>, vector<16x32xf32>,
    %c0_i32_14 = arith.constant 0 : i32
    %16 = arith.cmpi eq, %arg1, %c0_i32_14 : i32
    %17 = arith.extui %16 : i1 to i32
    %c0_i32_15 = arith.constant 0 : i32
    %18 = arith.cmpi ne, %17, %c0_i32_15 : i32
    scf.if %18 {
      %c0_16 = arith.constant 0 : index
      %c0_17 = arith.constant 0 : index
      %19 = vector.load %arg11[%c0_16, %c0_17] : memref<16x32xf32, #tpu.memory_space<vmem>>, vector<16x32xf32>
      %c0_18 = arith.constant 0 : index
      %c0_19 = arith.constant 0 : index
      %20 = vector.load %arg8[%c0_18, %c0_19] : memref<1x32xf32, #tpu.memory_space<vmem>>, vector<1x32xf32>
      %21 = vector.broadcast %20 : vector<1x32xf32> to vector<16x32xf32>
      %22 = arith.addf %19, %21 : vector<16x32xf32>
      %c0_20 = arith.constant 0 : index
      %c0_21 = arith.constant 0 : index
      %23 = vector.load %arg2[%c0_20, %c0_21] : memref<16x32xf32, #tpu.memory_space<vmem>>, vector<16x32xf32>
      %cst_22 = arith.constant 0.000000e+00 : f32
      %24 = vector.broadcast %cst_22 : f32 to vector<16x32xf32>
      %25 = arith.maximumf %22, %24 : vector<16x32xf32>
      %26 = arith.addf %23, %25 : vector<16x32xf32>
      %c0_23 = arith.constant 0 : index
      %c0_24 = arith.constant 0 : index
      %27 = vector.load %arg9[%c0_23, %c0_24] : memref<16x32xf32, #tpu.memory_space<vmem>>, vector<16x32xf32>
      tpu.vector_store %arg9[%c0_23, %c0_24], %26 {strides = array<i32>} : memref<16x32xf32, #tpu.memory_space<vmem>>, vector<16x32xf32>,
    } else {
    }
    return
  }
  func.func @transform_0(%arg0: i32, %arg1: i32) -> (i32, i32) {
    %c0_i32 = arith.constant 0 : i32
    %c0_i32_0 = arith.constant 0 : i32
    return %arg0, %c0_i32 : i32, i32
  }
  func.func @transform_1(%arg0: i32, %arg1: i32) -> (i32, i32) {
    %c0_i32 = arith.constant 0 : i32
    %c0_i32_0 = arith.constant 0 : i32
    %c0_i32_1 = arith.constant 0 : i32
    return %c0_i32, %c0_i32_0 : i32, i32
  }
  func.func @transform_2(%arg0: i32, %arg1: i32) -> (i32, i32) {
    %c0_i32 = arith.constant 0 : i32
    %c0_i32_0 = arith.constant 0 : i32
    %c0_i32_1 = arith.constant 0 : i32
    return %c0_i32, %c0_i32_0 : i32, i32
  }
  func.func @transform_3(%arg0: i32, %arg1: i32) -> (i32, i32) {
    %c0_i32 = arith.constant 0 : i32
    %c0_i32_0 = arith.constant 0 : i32
    return %c0_i32, %arg1 : i32, i32
  }
  func.func @transform_4(%arg0: i32, %arg1: i32) -> (i32, i32) {
    %c0_i32 = arith.constant 0 : i32
    %c0_i32_0 = arith.constant 0 : i32
    return %c0_i32, %arg1 : i32, i32
  }
  func.func @transform_5(%arg0: i32, %arg1: i32) -> (i32, i32) {
    %c0_i32 = arith.constant 0 : i32
    %c0_i32_0 = arith.constant 0 : i32
    return %arg1, %c0_i32 : i32, i32
  }
  func.func @transform_6(%arg0: i32, %arg1: i32) -> (i32, i32) {
    %c0_i32 = arith.constant 0 : i32
    %c0_i32_0 = arith.constant 0 : i32
    %c0_i32_1 = arith.constant 0 : i32
    return %c0_i32, %c0_i32_0 : i32, i32
  }
  func.func @transform_7(%arg0: i32, %arg1: i32) -> (i32, i32) {
    %c0_i32 = arith.constant 0 : i32
    %c0_i32_0 = arith.constant 0 : i32
    return %arg0, %c0_i32 : i32, i32
  }
}

</mosaic_0001>

<bundles_post_ra>
// kernel: tpu_custom_call.1
= control target key start
LH: loop header
LB: loop body
LE: loop exit
PB: predicated region body
PF: predicated region fallthrough
CT: control target
= control target key end

     0   :  { %vm33_vm0 = vcmask 261120   ;;  %s558_s0 = inlined_call_operand.vmem [shape: f32[16,32], index: 0, kind: input, shape index: {}]   ;;  %s559_s1 = inlined_call_operand.vmem [shape: f32[1,32], index: 1, kind: input, shape index: {}]   ;;  %s560_s2 = inlined_call_operand.vmem [shape: f32[1,32], index: 2, kind: input, shape index: {}]   ;;  %s561_s3 = inlined_call_operand.vmem [shape: f32[32,64], index: 3, kind: input, shape index: {}]   ;;  %s562_s4 = inlined_call_operand.vmem [shape: f32[1,64], index: 4, kind: input, shape index: {}]   ;;  %s563_s5 = inlined_call_operand.vmem [shape: f32[64,32], index: 5, kind: input, shape index: {}]   ;;  %s564_s6 = inlined_call_operand.vmem [shape: f32[1,32], index: 6, kind: input, shape index: {}]   ;;  %s565_s7 = inlined_call_operand.hbm [shape: f32[16,32], index: 7, kind: output, shape index: {}]  }
   0x1   :  { %v471_v0 = vld [vmem:[%s558_s0] sm:$0xff]  ;;  %v476_v1 = vld [vmem:[%s558_s0 + $0x8] sm:$0xff] }
   0x2   :  { %12 = vsyncpa [#allocation5], 0  ;;  %v34_v2 = vsel %vm33_vm0, %v471_v0, 0.0  ;;  %v37_v3 = vsel %vm33_vm0, %v476_v1, 0.0  ;;  %v85_v14 = vld [vmem:[%s561_s3] sm:$0xff]  ;;  %v86_v15 = vld [vmem:[%s561_s3 + $0x8] sm:$0xff] }
   0x3   :  { %35 = vadd.xlane.f32.xlu0 %v34_v2  ;;  %v368_v16 = vpack.c.bf16 %v86_v15, %v85_v14  ;;  %v87_v17 = vld [vmem:[%s561_s3 + $0x10] sm:$0xff]  ;;  %v88_v18 = vld [vmem:[%s561_s3 + $0x18] sm:$0xff]  ;;  %v182_v20 = vld [vmem:[%s563_s5] sm:$0xff]  ;;  %v424_v50 = vmov 0.0   ;;  %vm190_vm1 = vcmask 523264   ;;  %s425_s30 = smov [#allocation4]  }
   0x4   :  { %v372_v19 = vpack.c.bf16 %v88_v18, %v87_v17  ;;  %v183_v21 = vld [vmem:[%s563_s5 + $0x8] sm:$0xff]  ;;  %v184_v22 = vld [vmem:[%s563_s5 + $0x10] sm:$0xff]  ;;  %v185_v24 = vld [vmem:[%s563_s5 + $0x18] sm:$0xff]  ;;  %82 = vst.msk [vmem:[#allocation3 + $0x8] sm:$0xff] %vm33_vm0, %v424_v50  ;;  %s303_s8 = sshll.u32 %s425_s30, 4  ;;  %s304_s8 = int_to_ptr.vmem [resolvable:$true] %s303_s8 }
   0x5   :  { %369 = vmatprep.subr.bf16.mxu0 %v368_v16  ;;  %v376_v23 = vpack.c.bf16 %v183_v21, %v182_v20  ;;  %v380_v25 = vpack.c.bf16 %v185_v24, %v184_v22  ;;  %v186_v26 = vld [vmem:[%s563_s5 + $0x20] sm:$0xff]  ;;  %v187_v27 = vld [vmem:[%s563_s5 + $0x28] sm:$0xff]  ;;  %v188_v47 = vld [vmem:[%s563_s5 + $0x30] sm:$0xff]  ;;  %81 = vst.msk [vmem:[#allocation3] sm:$0xff] %vm33_vm0, %v424_v50  ;;  %s400_s9 = scalar_lea.vmem %s304_s8, 256  ;;  %p405_p1 = scmp.lt.s32.totalorder %s304_s8, %s304_s8 }
   0x6   :  { %371 = vmatpush3.bf16.msra.mxu0 %v368_v16  ;;  %v384_v28 = vpack.c.bf16 %v187_v27, %v186_v26  ;;  %v314_v36 = vld [vmem:[%s559_s1] ss:$0 sm:$0xff]  ;;  %v189_v48 = vld [vmem:[%s563_s5 + $0x38] sm:$0xff]  ;;  %p401_p0 = scmp.ne.s32.totalorder %s304_s8, %s400_s9  ;;  %p406_p2 = scmp.lt.s32.totalorder %s400_s9, %s400_s9 }
   0x7   :  { %38 = vadd.xlane.f32.xlu0 %v37_v3  ;;  %373 = vmatprep.subr.bf16.mxu0 %v372_v19  ;;  %v315_v38 = vld [vmem:[%s560_s2] ss:$0 sm:$0xff]  ;;  %v388_v49 = vpack.c.bf16 %v189_v48, %v188_v47 }
   0x8   :  { %377 = vmatprep.subr.bf16.mxu1 %v376_v23  ;;  %v316_v51 = vld [vmem:[%s562_s4] ss:$0 sm:$0xff]  ;;  %p407_p3 = por %p406_p2, %p405_p1 }
   0x9   :  { %379 = vmatpush3.bf16.msra.mxu1 %v376_v23  ;;  %v321_v2 = vld [vmem:[%s564_s6] ss:$0 sm:$0xff] }
   0xa   :  { %375 = vmatpush3.bf16.msra.mxu0 %v372_v19  ;;  %381 = vmatprep.subr.bf16.mxu1 %v380_v25  ;;  %p408_p4 = pnand %p407_p3, %p401_p0 }
   0xb   :  { %v181_v58 = vld [vmem:[#allocation3 + $0x8] sm:$0xff] }
   0xc   :  { %v180_v59 = vld [vmem:[#allocation3] sm:$0xff] }
   0xd   :  { %383 = vmatpush3.bf16.msra.mxu1 %v380_v25 }
   0xe   :  { %385 = vmatprep.subr.bf16.mxu1 %v384_v28 }
  0x11   :  { %387 = vmatpush3.bf16.msra.mxu1 %v384_v28 }
  0x12   :  { %389 = vmatprep.subr.bf16.mxu1 %v388_v49 }
  0x15   :  { %391 = vmatpush3.bf16.msra.mxu1 %v388_v49 }
  0x90   :  { %v36_v4 = vpop.xlane.xlu0 %35 }
  0x91   :  { %v41_v5 = vmul.f32 0.03125, %v36_v4 }
  0x93   :  { %v43_v6 = vsub.f32 %v471_v0, %v41_v5 }
  0x94   :  { %v39_v7 = vpop.xlane.xlu0 %38 }
  0x95   :  { %v42_v8 = vmul.f32 0.03125, %v39_v7  ;;  %v45_v9 = vmul.f32 %v43_v6, %v43_v6 }
  0x97   :  { %v44_v10 = vsub.f32 %v476_v1, %v42_v8  ;;  %v47_v11 = vsel %vm33_vm0, %v45_v9, 0.0 }
  0x98   :  { %48 = vadd.xlane.f32.xlu1 %v47_v11 }
  0x99   :  { %v46_v12 = vmul.f32 %v44_v10, %v44_v10 }
  0x9b   :  { %v50_v13 = vsel %vm33_vm0, %v46_v12, 0.0 }
  0x9c   :  { %51 = vadd.xlane.f32.xlu1 %v50_v13 }
 0x125   :  { %v49_v29 = vpop.xlane.xlu1 %48 }
 0x126   :  { %v53_v30 = vmul.f32 0.03125, %v49_v29 }
 0x128   :  { %v55_v31 = vadd.f32 1e-05, %v53_v30 }
 0x129   :  { %v52_v32 = vpop.xlane.xlu1 %51 }
 0x12a   :  { %396 = vrsqrt.f32 %v55_v31  ;;  %v54_v33 = vmul.f32 0.03125, %v52_v32 }
 0x12c   :  { %v56_v34 = vadd.f32 1e-05, %v54_v33 }
 0x12e   :  { %398 = vrsqrt.f32 %v56_v34 }
 0x134   :  { %v397_v35 = vpop.eup %396 }
 0x135   :  { %v59_v37 = vmul.f32 %v397_v35, %v43_v6 }
 0x137   :  { %v68_v39 = vmul.f32 %v314_v36, %v59_v37 }
 0x138   :  { %v399_v40 = vpop.eup %398 }
 0x139   :  { %v77_v41 = vadd.f32 %v315_v38, %v68_v39  ;;  %v60_v42 = vmul.f32 %v399_v40, %v44_v10 }
 0x13b   :  { %79 = vst.msk [vmem:[#allocation2] sm:$0xff] %vm33_vm0, %v77_v41  ;;  %v69_v43 = vmul.f32 %v314_v36, %v60_v42 }
 0x13d   :  { %v78_v44 = vadd.f32 %v315_v38, %v69_v43 }
 0x13f   :  { %80 = vst.msk [vmem:[#allocation2 + $0x8] sm:$0xff] %vm33_vm0, %v78_v44 }
 0x142   :  { %v83_v45 = vld [vmem:[#allocation2] sm:$0xff] }
 0x143   :  { %346 = vmatprep.mubr.msk.f32.mxu0 %vm33_vm0, %v83_v45 }
 0x146   :  { %v84_v46 = vld [vmem:[#allocation2 + $0x8] sm:$0xff] }
 0x147   :  { %347 = vmatmul.mubr.msk.f32.vlgmr.msra.gmra.mrb[0].mxu0 %vm33_vm0, %v84_v46 }
 0x21a   :  { %v348_v52 = vpop.f32.mrb[0].mxu0 }
 0x21b   :  { %v175_v53 = vadd.f32 %v348_v52, %v316_v51  ;;  %v169_v54 = vpop.f32.mrb[1].mxu0 }
 0x21c   :  { %v170_v55 = vadd.f32 %v316_v51, %v169_v54 }
 0x21d   :  { %v179_v57 = vmax.f32 %v175_v53, 0.0 }
 0x21e   :  { %v178_v56 = vmax.f32 %v170_v55, 0.0 }
 0x220   :  { %365 = vmatprep.mubr.msk.f32.mxu1 %vm190_vm1, %v178_v56 }
 0x221   :  { %366 = vmatmul.mubr.msk.f32.vlgmr.msra.gmra.mrb[0].mxu1 %vm190_vm1, %v179_v57 }
 0x2f4   :  { %v367_v60 = vpop.f32.mrb[0].mxu1 }
 0x2f5   :  { %v273_v61 = vadd.f32 %v367_v60, %v181_v58  ;;  %v263_v62 = vpop.f32.mrb[1].mxu1 }
 0x2f6   :  { %v272_v63 = vadd.f32 %v263_v62, %v180_v59 }
 0x2f7   :  { %275 = vst.msk [vmem:[#allocation3 + $0x8] sm:$0xff] %vm33_vm0, %v273_v61 }
 0x2f8   :  { %274 = vst.msk [vmem:[#allocation3] sm:$0xff] %vm33_vm0, %v272_v63 }
 0x2fe   :  { %v280_v3 = vld [vmem:[#allocation3 + $0x8] sm:$0xff] }
 0x2ff   :  { %v279_v4 = vld [vmem:[#allocation3] sm:$0xff]  ;;  %v289_v5 = vadd.f32 %v321_v2, %v280_v3 }
 0x300   :  { %v288_v6 = vadd.f32 %v321_v2, %v279_v4 }
 0x301   :  { %v293_v7 = vmax.f32 %v289_v5, 0.0 }
 0x302   :  { %v292_v8 = vmax.f32 %v288_v6, 0.0 }
 0x303   :  { %v295_v9 = vadd.f32 %v293_v7, %v476_v1 }
 0x304   :  { %v294_v10 = vadd.f32 %v292_v8, %v471_v0 }
 0x305   :  { %297 = vst.msk [vmem:[#allocation4 + $0x8] sm:$0xff] %vm33_vm0, %v295_v9 }
 0x306   :  { %296 = vst.msk [vmem:[#allocation4] sm:$0xff] %vm33_vm0, %v294_v10 }
 0x307   :  { %411 = shalt.err (!%p408_p4)
}
 0x308   :  { %s412_s11 = scalar_lea.hbm %s565_s7, 256 }
 0x309   :  { %p413_p5 = scmp.ne.s32.totalorder %s565_s7, %s412_s11  ;;  %p416_p6 = scmp.lt.u32.totalorder %s412_s11, %s565_s7 }
 0x30b   :  { %p418_p7 = pnand %p416_p6, %p413_p5 }
 0x30d   :  { %421 = shalt.err (!%p418_p7)
}
 0x30e   :  { %s426_s16 = smov 128   ;;  %s427_s17 = smov 8  }
 0x30f   :  { %309 = dma.vmem_to_hbm [thread:$0]  %s304_s8, 256, %s565_s7, [#allocation5], %s426_s16, %s426_s16, %s427_s17  }
 0x310   :  { %422 = dma.done.wait [#allocation5], 256  }
 0x311   :  { %423 = vsyncadd [#allocation5], 4294967040 }
 0x312   :  { %313 = vsyncpa [#allocation5], 1 }

</bundles_post_ra>
